<compile_context>
chip_gen: v7x
topology: tpu7x:2x2x1
jax: 0.10.0
libtpu: 0.0.40
codegen_flags: <defaults>
</compile_context>

<pallas_src>
import functools
import math

import jax
import jax.numpy as jnp
from jax import lax
from jax.experimental import pallas as pl
from jax.experimental.pallas import tpu as pltpu


def _round_up(a, b):
    return ((a + b - 1) // b) * b


def _label_smoothing_kernel(x_ref, tgt_ref, out_ref, *,
                            confidence, smooth_val, log_conf, log_smooth,
                            padding_idx):
    x = x_ref[...].astype(jnp.float32)      # (TN, V) log-probabilities
    tgt = tgt_ref[...]                      # (TN, 1) int32; -1 marks padded rows

    col = lax.broadcasted_iota(jnp.int32, x.shape, 1)   # lane (vocab) indices
    is_tgt = col == tgt

    # true_dist only takes two nonzero values -> logs are compile-time constants.
    coeff = jnp.where(is_tgt, jnp.float32(confidence), jnp.float32(smooth_val))
    logp = jnp.where(is_tgt, jnp.float32(log_conf), jnp.float32(log_smooth))
    terms = coeff * (logp - x)

    # Column padding_idx is zeroed AFTER the scatter (matches the reference ordering).
    terms = jnp.where(col == padding_idx, jnp.float32(0.0), terms)

    # Rows added by wrapper-side padding (tgt < 0) must contribute nothing.
    # (Per the reference, rows whose *real* target == padding_idx are NOT masked.)
    terms = terms * (tgt >= 0).astype(jnp.float32)

    # Lane-dense partial: fold row groups of 8 with plain VPU adds; the cross-lane
    # reduction to a scalar happens once, outside the kernel.
    tn, v = terms.shape
    out_ref[...] = terms.reshape(tn // 8, 8, v).sum(axis=0)


def label_smoothing_loss(x, tgt, *, size, padding_idx, smoothing,
                         tile_n=1024, max_block_bytes=4 * 1024 * 1024):
    """Pallas implementation of LabelSmoothing.forward. Returns a scalar f32."""
    N, V = x.shape
    assert V == size, "size must equal x.shape[1]"

    confidence = 1.0 - smoothing
    smooth_val = smoothing / (size - 2)
    log_conf = math.log(confidence) if confidence > 0.0 else 0.0
    log_smooth = math.log(smooth_val) if smooth_val > 0.0 else 0.0

    # --- pick a row tile: as big as possible while keeping the x block <= max_block_bytes
    itemsize = jnp.dtype(x.dtype).itemsize
    cap = max(8, (max_block_bytes // (V * itemsize)) // 8 * 8)
    tn = max(8, min(tile_n, cap, _round_up(N, 8)))
    tn = (tn // 8) * 8
    n_pad = _round_up(N, tn)
    num_tiles = n_pad // tn

    tgt_col = tgt.reshape(N, 1).astype(jnp.int32)
    if n_pad != N:
        x = jnp.pad(x, ((0, n_pad - N), (0, 0)))
        tgt_col = jnp.pad(tgt_col, ((0, n_pad - N), (0, 0)), constant_values=-1)

    kernel = functools.partial(
        _label_smoothing_kernel,
        confidence=confidence,
        smooth_val=smooth_val,
        log_conf=log_conf,
        log_smooth=log_smooth,
        padding_idx=padding_idx,
    )

    # Budget: 2 double-buffered x blocks + small tgt/out blocks, with headroom.
    vmem_limit = min(max(2 * tn * V * itemsize * 2 + (8 << 20), 32 << 20), 100 << 20)

    partials = pl.pallas_call(
        kernel,
        out_shape=jax.ShapeDtypeStruct((num_tiles * 8, V), jnp.float32),
        grid=(num_tiles,),
        in_specs=[
            pl.BlockSpec((tn, V), lambda i: (i, 0)),   # x tile (rows x full vocab)
            pl.BlockSpec((tn, 1), lambda i: (i, 0)),   # tgt column tile
        ],
        out_specs=pl.BlockSpec((8, V), lambda i: (i, 0)),  # lane-dense per-tile partial
        compiler_params=pltpu.CompilerParams(
            dimension_semantics=("parallel",),         # independent row tiles (megacore OK)
            vmem_limit_bytes=int(vmem_limit),
        ),
    )(x, tgt_col)

    return jnp.sum(partials)


def _reference_loss(x, tgt, *, size, padding_idx, smoothing):
    """Pure-JAX reference mirroring the PyTorch code path (for sanity checking)."""
    confidence = 1.0 - smoothing
    smooth_val = smoothing / (size - 2)
    N, V = x.shape
    col = jnp.arange(V)[None, :]
    true_dist = jnp.where(col == tgt[:, None], confidence, smooth_val)
    true_dist = jnp.where(col == padding_idx, 0.0, true_dist)
    pos = true_dist > 0
    safe = jnp.where(pos, true_dist, 1.0)
    x32 = x.astype(jnp.float32)
    return jnp.sum(jnp.where(pos, true_dist * (jnp.log(safe) - x32), 0.0))


if __name__ == "__main__":
    # Module config (deterministic, in-script).
    SIZE = 128          # vocab size (x.shape[1])
    PADDING_IDX = 0
    SMOOTHING = 0.1
    N = 10              # number of tokens (not a multiple of 8 -> exercises padding/mask path)

    key = jax.random.PRNGKey(0)
    kx, kt = jax.random.split(key)

    logits = jax.random.normal(kx, (N, SIZE), dtype=jnp.float32)
    x = jax.nn.log_softmax(logits, axis=-1)                       # log-probabilities
    tgt = jax.random.randint(kt, (N,), 0, SIZE, dtype=jnp.int32)
    tgt = tgt.at[3].set(PADDING_IDX)                              # include a padding target

    loss = label_smoothing_loss(
        x, tgt, size=SIZE, padding_idx=PADDING_IDX, smoothing=SMOOTHING
    )
    loss = jax.block_until_ready(loss)

    ref = _reference_loss(x, tgt, size=SIZE, padding_idx=PADDING_IDX,
                          smoothing=SMOOTHING)
    assert jnp.allclose(loss, ref, rtol=1e-5, atol=1e-5), (loss, ref)

    print("KERNEL_OK")
</pallas_src>

<mosaic_0001>
module attributes {stable_mosaic.version = 11 : i64} {
  func.func @_label_smoothing_kernel(%arg0: i32, %arg1: memref<16x128xf32, #tpu.memory_space<vmem>>, %arg2: memref<16x1xi32, #tpu.memory_space<vmem>>, %arg3: memref<8x128xf32, #tpu.memory_space<vmem>>) attributes {dimension_semantics = [#tpu.dimension_semantics<parallel>], iteration_bounds = array<i64: 1>, scalar_prefetch = 0 : i64, scratch_operands = 0 : i64, tpu.core_type = #tpu.core_type<tc>, window_params = [{transform_indices = @transform_0, window_bounds = array<i64: 16, 128>}, {transform_indices = @transform_1, window_bounds = array<i64: 16, 1>}, {transform_indices = @transform_2, window_bounds = array<i64: 8, 128>}]} {
    %c0 = arith.constant 0 : index
    %c0_0 = arith.constant 0 : index
    %0 = vector.load %arg1[%c0, %c0_0] : memref<16x128xf32, #tpu.memory_space<vmem>>, vector<16x128xf32>
    %c0_1 = arith.constant 0 : index
    %c0_2 = arith.constant 0 : index
    %1 = vector.load %arg2[%c0_1, %c0_2] : memref<16x1xi32, #tpu.memory_space<vmem>>, vector<16x1xi32>
    %2 = tpu.iota {dimensions = array<i32: 1>} : vector<16x128xi32>
    %3 = vector.broadcast %1 : vector<16x1xi32> to vector<16x128xi32>
    %4 = arith.cmpi eq, %2, %3 : vector<16x128xi32>
    %cst = arith.constant 0.899999976 : f32
    %cst_3 = arith.constant 7.93650805E-4 : f32
    %5 = vector.broadcast %cst : f32 to vector<16x128xf32>
    %6 = vector.broadcast %cst_3 : f32 to vector<16x128xf32>
    %7 = arith.select %4, %5, %6 : vector<16x128xi1>, vector<16x128xf32>
    %cst_4 = arith.constant -0.105360515 : f32
    %cst_5 = arith.constant -7.1388669 : f32
    %8 = vector.broadcast %cst_4 : f32 to vector<16x128xf32>
    %9 = vector.broadcast %cst_5 : f32 to vector<16x128xf32>
    %10 = arith.select %4, %8, %9 : vector<16x128xi1>, vector<16x128xf32>
    %11 = arith.subf %10, %0 : vector<16x128xf32>
    %12 = arith.mulf %7, %11 : vector<16x128xf32>
    %c0_i32 = arith.constant 0 : i32
    %13 = vector.broadcast %c0_i32 : i32 to vector<16x128xi32>
    %14 = arith.cmpi eq, %2, %13 : vector<16x128xi32>
    %cst_6 = arith.constant 0.000000e+00 : f32
    %15 = vector.broadcast %cst_6 : f32 to vector<16x128xf32>
    %16 = arith.select %14, %15, %12 : vector<16x128xi1>, vector<16x128xf32>
    %c0_i32_7 = arith.constant 0 : i32
    %17 = vector.broadcast %c0_i32_7 : i32 to vector<16x1xi32>
    %18 = arith.cmpi sge, %1, %17 : vector<16x1xi32>
    %19 = arith.extui %18 : vector<16x1xi1> to vector<16x1xi32>
    %20 = arith.sitofp %19 : vector<16x1xi32> to vector<16x1xf32>
    %21 = vector.broadcast %20 : vector<16x1xf32> to vector<16x128xf32>
    %22 = arith.mulf %16, %21 : vector<16x128xf32>
    %23 = vector.shape_cast %22 : vector<16x128xf32> to vector<2x8x128xf32>
    %cst_8 = arith.constant dense<0.000000e+00> : vector<8x128xf32>
    %24 = vector.multi_reduction <add>, %23, %cst_8 [0] : vector<2x8x128xf32> to vector<8x128xf32>
    %c0_9 = arith.constant 0 : index
    %c0_10 = arith.constant 0 : index
    %25 = vector.load %arg3[%c0_9, %c0_10] : memref<8x128xf32, #tpu.memory_space<vmem>>, vector<8x128xf32>
    tpu.vector_store %arg3[%c0_9, %c0_10], %24 {strides = array<i32>} : memref<8x128xf32, #tpu.memory_space<vmem>>, vector<8x128xf32>,
    return
  }
  func.func @transform_0(%arg0: i32) -> (i32, i32) {
    %c0_i32 = arith.constant 0 : i32
    %c0_i32_0 = arith.constant 0 : i32
    return %arg0, %c0_i32 : i32, i32
  }
  func.func @transform_1(%arg0: i32) -> (i32, i32) {
    %c0_i32 = arith.constant 0 : i32
    %c0_i32_0 = arith.constant 0 : i32
    return %arg0, %c0_i32 : i32, i32
  }
  func.func @transform_2(%arg0: i32) -> (i32, i32) {
    %c0_i32 = arith.constant 0 : i32
    %c0_i32_0 = arith.constant 0 : i32
    return %arg0, %c0_i32 : i32, i32
  }
}

</mosaic_0001>

<bundles_post_ra>
// kernel: tpu_custom_call.1
= control target key start
LH: loop header
LB: loop body
LE: loop exit
PB: predicated region body
PF: predicated region fallthrough
CT: control target
= control target key end

     0   :  { %v109_v2 = vmov 0   ;;  %v110_v3 = vmov 0.0   ;;  %s153_s0 = inlined_call_operand.vmem [shape: f32[16,128], index: 0, kind: input, shape index: {}]   ;;  %s154_s1 = inlined_call_operand.vmem [shape: s32[16,1], index: 1, kind: input, shape index: {}]   ;;  %s155_s2 = inlined_call_operand.hbm [shape: f32[8,128], index: 2, kind: output, shape index: {}]  }
   0x1   :  { %v14_v0 = vld [vmem:[%s154_s1] sm:$0xff]  ;;  %v15_v1 = vld [vmem:[%s154_s1 + $0x8] sm:$0xff]  ;;  %78 = vset.pattern.permute.xlu0 %v109_v2  ;;  %79 = vset.pattern.permute.xlu1 %v109_v2 }
   0x2   :  { %vm37_vm0 = vcmp.ge.s32.totalorder %v14_v0, 0  ;;  %vm38_vm1 = vcmp.ge.s32.totalorder %v15_v1, 0  ;;  %19 = vperm.xlu0 %78, %v14_v0  }
   0x3   :  { %v71_v4 = vsel %vm37_vm0, 1.0, %v110_v3  ;;  %v72_v5 = vsel %vm38_vm1, 1.0, %v110_v3 }
   0x4   :  { %7 = vsyncpa [#allocation3], 0  ;;  %v80_v6 = vpack.i.bf16 %v72_v5, %v71_v4  ;;  %v16_v7 = vlaneseq  ;;  %v12_v10 = vld [vmem:[%s153_s0] sm:$0xff]  ;;  %v111_v11 = vmov -7.138867   ;;  %v13_v17 = vld [vmem:[%s153_s0 + $0x8] sm:$0xff] }
   0x5   :  { %v112_v14 = vmov 0.0007936508   ;;  %s113_s16 = smov [#allocation2]  }
   0x6   :  { %81 = vperm.xlu1 %79, %v80_v6   ;;  %22 = vperm.xlu0 %78, %v15_v1   ;;  %v17_v8 = vand.u32 127, %v16_v7  ;;  %s63_s17 = sshll.u32 %s113_s16, 4  ;;  %s64_s17 = int_to_ptr.vmem [resolvable:$true] %s63_s17 }
   0x7   :  { %s85_s0 = scalar_lea.vmem %s64_s17, 128  ;;  %p90_p1 = scmp.lt.s32.totalorder %s64_s17, %s64_s17 }
   0x8   :  { %vm34_vm4 = vcmp.eq.s32.totalorder %v17_v8, 0  ;;  %p86_p0 = scmp.ne.s32.totalorder %s64_s17, %s85_s0  ;;  %p91_p2 = scmp.lt.s32.totalorder %s85_s0, %s85_s0 }
   0xa   :  { %p92_p3 = por %p91_p2, %p90_p1 }
   0xc   :  { %p93_p4 = pnand %p92_p3, %p86_p0 }
  0x81   :  { %v20_v9 = vpop.permute.xlu0 %19 }
  0x82   :  { %vm24_vm2 = vcmp.eq.s32.totalorder %v17_v8, %v20_v9 }
  0x83   :  { %v28_v12 = vsel %vm24_vm2, -0.105360515, %v111_v11  ;;  %v26_v15 = vsel %vm24_vm2, 0.9, %v112_v14 }
  0x84   :  { %v30_v13 = vsub.f32 %v28_v12, %v12_v10 }
  0x85   :  { %v23_v16 = vpop.permute.xlu0 %22  ;;  %v82_v19 = vpop.permute.xlu1 %81 }
  0x86   :  { %v32_v18 = vmul.f32 %v30_v13, %v26_v15  ;;  %vm25_vm3 = vcmp.eq.s32.totalorder %v17_v8, %v23_v16  ;;  %v84_v23 = vunpack.i.h.bf16 %v82_v19  ;;  %v83_v24 = vunpack.i.l.bf16 %v82_v19 }
  0x87   :  { %v29_v20 = vsel %vm25_vm3, -0.105360515, %v111_v11  ;;  %v27_v22 = vsel %vm25_vm3, 0.9, %v112_v14 }
  0x88   :  { %v31_v21 = vsub.f32 %v29_v20, %v13_v17  ;;  %v35_v26 = vsel %vm34_vm4, 0.0, %v32_v18 }
  0x89   :  { %v53_v28 = vmul.f32 %v83_v24, %v35_v26 }
  0x8a   :  { %v33_v25 = vmul.f32 %v31_v21, %v27_v22 }
  0x8c   :  { %v36_v27 = vsel %vm34_vm4, 0.0, %v33_v25 }
  0x8d   :  { %v54_v29 = vmul.f32 %v84_v23, %v36_v27 }
  0x8f   :  { %v55_v30 = vadd.f32 %v54_v29, %v53_v28 }
  0x91   :  { %56 = vst [vmem:[#allocation2] sm:$0xff] %v55_v30 }
  0x92   :  { %96 = shalt.err (!%p93_p4)
}
  0x93   :  { %s97_s20 = scalar_lea.hbm %s155_s2, 128 }
  0x94   :  { %p98_p5 = scmp.ne.s32.totalorder %s155_s2, %s97_s20  ;;  %p101_p6 = scmp.lt.u32.totalorder %s97_s20, %s155_s2 }
  0x96   :  { %p103_p7 = pnand %p101_p6, %p98_p5 }
  0x98   :  { %106 = shalt.err (!%p103_p7)
}
  0x99   :  { %66 = dma.vmem_to_hbm [thread:$0]  %s64_s17, 128, %s155_s2, [#allocation3]  }
  0x9a   :  { %107 = dma.done.wait [#allocation3], 128  }
  0x9b   :  { %108 = vsyncadd [#allocation3], 4294967168 }
  0x9c   :  { %70 = vsyncpa [#allocation3], 1 }

</bundles_post_ra>
